<compile_context>
chip_gen: v7x
topology: tpu7x:2x2x1
jax: 0.10.0
libtpu: 0.0.40
codegen_flags: <defaults>
</compile_context>

<pallas_src>
import functools

import jax
import jax.numpy as jnp
from jax.experimental import pallas as pl
from jax.experimental.pallas import tpu as pltpu

_LANE = 128   # vreg lane width
_SUBLANE = 8  # vreg sublane count


def _round_up(x, m):
    return ((x + m - 1) // m) * m


def actor_kernel(x_ref, w1_ref, b1_ref, w2_ref, b2_ref, w3_ref, b3_ref, o_ref):
    # One (large) batch tile per grid step; all weight matrices live in VMEM.
    x = x_ref[...]  # (TB, S_pad)

    h1 = jnp.dot(x, w1_ref[...], preferred_element_type=jnp.float32) + b1_ref[...]
    h1 = jnp.maximum(h1, 0.0)  # ReLU

    h2 = jnp.dot(h1, w2_ref[...], preferred_element_type=jnp.float32) + b2_ref[...]
    h2 = jnp.maximum(h2, 0.0)  # ReLU

    a = jnp.dot(h2, w3_ref[...], preferred_element_type=jnp.float32) + b3_ref[...]
    # tanh rides the EUP slot; *2.0 rides the VPU — keep both fused in-kernel.
    o_ref[...] = (jnp.tanh(a) * 2.0).astype(o_ref.dtype)


@functools.partial(jax.jit, static_argnames=("max_tile_b",))
def actor_forward(state, w1, b1, w2, b2, w3, b3, *, max_tile_b=512):
    B, S = state.shape
    H = w1.shape[1]
    A = w3.shape[1]

    # --- lane / sublane friendly padded shapes -------------------------------
    S_pad = _round_up(S, _LANE)
    H_pad = _round_up(H, _LANE)
    A_pad = _round_up(A, _LANE)

    # Batch tile: whole (padded) batch when small -> grid=(1,); otherwise large
    # 512-row tiles (multiple of 256 for v6e/v7x MXU M and of 8 sublanes).
    B_sub = _round_up(B, _SUBLANE)
    tile_b = B_sub if B_sub <= max_tile_b else max_tile_b
    B_pad = _round_up(B_sub, tile_b)

    f32 = jnp.float32

    # --- zero-pad inputs and parameters (math-preserving) --------------------
    x_p = jnp.pad(state.astype(f32), ((0, B_pad - B), (0, S_pad - S)))
    w1_p = jnp.pad(w1.astype(f32), ((0, S_pad - S), (0, H_pad - H)))
    b1_p = jnp.pad(b1.astype(f32).reshape(1, H), ((0, 0), (0, H_pad - H)))
    w2_p = jnp.pad(w2.astype(f32), ((0, H_pad - H), (0, H_pad - H)))
    b2_p = jnp.pad(b2.astype(f32).reshape(1, H), ((0, 0), (0, H_pad - H)))
    w3_p = jnp.pad(w3.astype(f32), ((0, H_pad - H), (0, A_pad - A)))
    b3_p = jnp.pad(b3.astype(f32).reshape(1, A), ((0, 0), (0, A_pad - A)))

    grid = (B_pad // tile_b,)

    out_padded = pl.pallas_call(
        actor_kernel,
        out_shape=jax.ShapeDtypeStruct((B_pad, A_pad), f32),
        grid_spec=pltpu.PrefetchScalarGridSpec(
            num_scalar_prefetch=0,
            grid=grid,
            in_specs=[
                pl.BlockSpec((tile_b, S_pad), lambda i: (i, 0)),  # state tile
                pl.BlockSpec((S_pad, H_pad), lambda i: (0, 0)),   # w1 (resident)
                pl.BlockSpec((1, H_pad), lambda i: (0, 0)),       # b1
                pl.BlockSpec((H_pad, H_pad), lambda i: (0, 0)),   # w2
                pl.BlockSpec((1, H_pad), lambda i: (0, 0)),       # b2
                pl.BlockSpec((H_pad, A_pad), lambda i: (0, 0)),   # w3
                pl.BlockSpec((1, A_pad), lambda i: (0, 0)),       # b3
            ],
            out_specs=pl.BlockSpec((tile_b, A_pad), lambda i: (i, 0)),
        ),
        compiler_params=pltpu.CompilerParams(
            dimension_semantics=("parallel",),  # batch tiles shard across TCs (v7x)
        ),
    )(x_p, w1_p, b1_p, w2_p, b2_p, w3_p, b3_p)

    # Slice back to the logical (B, A) result.
    return out_padded[:B, :A]


def init_actor_params(key, state_size, action_size, hidden_size=256, init_w=0.003):
    """Deterministic init mirroring the PyTorch module's __init__ semantics:
    fc1/fc2 use the default nn.Linear uniform(-1/sqrt(fan_in), 1/sqrt(fan_in)),
    fc3 weight/bias use uniform(-init_w, init_w)."""
    k1, k2, k3, k4, k5, k6 = jax.random.split(key, 6)

    def linear_init(kw, kb, fan_in, fan_out):
        bound = 1.0 / jnp.sqrt(jnp.float32(fan_in))
        w = jax.random.uniform(kw, (fan_in, fan_out), jnp.float32, -bound, bound)
        b = jax.random.uniform(kb, (fan_out,), jnp.float32, -bound, bound)
        return w, b

    w1, b1 = linear_init(k1, k2, state_size, hidden_size)
    w2, b2 = linear_init(k3, k4, hidden_size, hidden_size)
    w3 = jax.random.uniform(k5, (hidden_size, action_size), jnp.float32, -init_w, init_w)
    b3 = jax.random.uniform(k6, (action_size,), jnp.float32, -init_w, init_w)
    return w1, b1, w2, b2, w3, b3


def actor_reference(state, w1, b1, w2, b2, w3, b3):
    h1 = jax.nn.relu(state @ w1 + b1)
    h2 = jax.nn.relu(h1 @ w2 + b2)
    return jnp.tanh(h2 @ w3 + b3) * 2.0


if __name__ == "__main__":
    # Small shapes consistent with the module's forward (2-D state input).
    batch = 16
    state_size = 8
    hidden_size = 32
    action_size = 4

    key = jax.random.PRNGKey(0)
    kx, kp = jax.random.split(key)
    state = jax.random.normal(kx, (batch, state_size), jnp.float32)
    params = init_actor_params(kp, state_size, action_size, hidden_size, init_w=0.003)

    out = actor_forward(state, *params)
    out = jax.block_until_ready(out)

    ref = actor_reference(state, *params)
    assert out.shape == (batch, action_size)
    assert jnp.allclose(out, ref, atol=1e-5, rtol=1e-5), "Pallas output mismatch vs reference"

    # Also exercise a larger, multi-tile batch to cover the grid>1 path.
    big_b = 1536
    state_big = jax.random.normal(jax.random.PRNGKey(1), (big_b, state_size), jnp.float32)
    out_big = jax.block_until_ready(actor_forward(state_big, *params))
    ref_big = actor_reference(state_big, *params)
    assert out_big.shape == (big_b, action_size)
    assert jnp.allclose(out_big, ref_big, atol=1e-5, rtol=1e-5), "multi-tile mismatch"

    print("KERNEL_OK")
</pallas_src>

<mosaic_0001>
module attributes {stable_mosaic.version = 11 : i64} {
  func.func @actor_kernel(%arg0: i32, %arg1: memref<16x128xf32, #tpu.memory_space<vmem>>, %arg2: memref<128x128xf32, #tpu.memory_space<vmem>>, %arg3: memref<1x128xf32, #tpu.memory_space<vmem>>, %arg4: memref<128x128xf32, #tpu.memory_space<vmem>>, %arg5: memref<1x128xf32, #tpu.memory_space<vmem>>, %arg6: memref<128x128xf32, #tpu.memory_space<vmem>>, %arg7: memref<1x128xf32, #tpu.memory_space<vmem>>, %arg8: memref<16x128xf32, #tpu.memory_space<vmem>>) attributes {dimension_semantics = [#tpu.dimension_semantics<parallel>], iteration_bounds = array<i64: 1>, scalar_prefetch = 0 : i64, scratch_operands = 0 : i64, tpu.core_type = #tpu.core_type<tc>, window_params = [{transform_indices = @transform_0, window_bounds = array<i64: 16, 128>}, {pipeline_mode = #tpu.pipeline_mode<synchronous>, transform_indices = @transform_1, window_bounds = array<i64: 128, 128>}, {pipeline_mode = #tpu.pipeline_mode<synchronous>, transform_indices = @transform_2, window_bounds = array<i64: 1, 128>}, {pipeline_mode = #tpu.pipeline_mode<synchronous>, transform_indices = @transform_3, window_bounds = array<i64: 128, 128>}, {pipeline_mode = #tpu.pipeline_mode<synchronous>, transform_indices = @transform_4, window_bounds = array<i64: 1, 128>}, {pipeline_mode = #tpu.pipeline_mode<synchronous>, transform_indices = @transform_5, window_bounds = array<i64: 128, 128>}, {pipeline_mode = #tpu.pipeline_mode<synchronous>, transform_indices = @transform_6, window_bounds = array<i64: 1, 128>}, {transform_indices = @transform_7, window_bounds = array<i64: 16, 128>}]} {
    %c0 = arith.constant 0 : index
    %c0_0 = arith.constant 0 : index
    %0 = vector.load %arg1[%c0, %c0_0] : memref<16x128xf32, #tpu.memory_space<vmem>>, vector<16x128xf32>
    %c0_1 = arith.constant 0 : index
    %c0_2 = arith.constant 0 : index
    %1 = vector.load %arg2[%c0_1, %c0_2] : memref<128x128xf32, #tpu.memory_space<vmem>>, vector<128x128xf32>
    %cst = arith.constant dense<0.000000e+00> : vector<16x128xf32>
    %2 = tpu.matmul %0, %1, %cst {dimension_numbers = #tpu.dot_dimension_numbers<[1], [0], [0], [1], [0, 0, 1, 1], [], []>} : vector<16x128xf32>, vector<128x128xf32>, vector<16x128xf32> -> vector<16x128xf32>
    %c0_3 = arith.constant 0 : index
    %c0_4 = arith.constant 0 : index
    %3 = vector.load %arg3[%c0_3, %c0_4] : memref<1x128xf32, #tpu.memory_space<vmem>>, vector<1x128xf32>
    %4 = vector.broadcast %3 : vector<1x128xf32> to vector<16x128xf32>
    %5 = arith.addf %2, %4 : vector<16x128xf32>
    %cst_5 = arith.constant 0.000000e+00 : f32
    %6 = vector.broadcast %cst_5 : f32 to vector<16x128xf32>
    %7 = arith.maximumf %5, %6 : vector<16x128xf32>
    %c0_6 = arith.constant 0 : index
    %c0_7 = arith.constant 0 : index
    %8 = vector.load %arg4[%c0_6, %c0_7] : memref<128x128xf32, #tpu.memory_space<vmem>>, vector<128x128xf32>
    %cst_8 = arith.constant dense<0.000000e+00> : vector<16x128xf32>
    %9 = tpu.matmul %7, %8, %cst_8 {dimension_numbers = #tpu.dot_dimension_numbers<[1], [0], [0], [1], [0, 0, 1, 1], [], []>} : vector<16x128xf32>, vector<128x128xf32>, vector<16x128xf32> -> vector<16x128xf32>
    %c0_9 = arith.constant 0 : index
    %c0_10 = arith.constant 0 : index
    %10 = vector.load %arg5[%c0_9, %c0_10] : memref<1x128xf32, #tpu.memory_space<vmem>>, vector<1x128xf32>
    %11 = vector.broadcast %10 : vector<1x128xf32> to vector<16x128xf32>
    %12 = arith.addf %9, %11 : vector<16x128xf32>
    %cst_11 = arith.constant 0.000000e+00 : f32
    %13 = vector.broadcast %cst_11 : f32 to vector<16x128xf32>
    %14 = arith.maximumf %12, %13 : vector<16x128xf32>
    %c0_12 = arith.constant 0 : index
    %c0_13 = arith.constant 0 : index
    %15 = vector.load %arg6[%c0_12, %c0_13] : memref<128x128xf32, #tpu.memory_space<vmem>>, vector<128x128xf32>
    %cst_14 = arith.constant dense<0.000000e+00> : vector<16x128xf32>
    %16 = tpu.matmul %14, %15, %cst_14 {dimension_numbers = #tpu.dot_dimension_numbers<[1], [0], [0], [1], [0, 0, 1, 1], [], []>} : vector<16x128xf32>, vector<128x128xf32>, vector<16x128xf32> -> vector<16x128xf32>
    %c0_15 = arith.constant 0 : index
    %c0_16 = arith.constant 0 : index
    %17 = vector.load %arg7[%c0_15, %c0_16] : memref<1x128xf32, #tpu.memory_space<vmem>>, vector<1x128xf32>
    %18 = vector.broadcast %17 : vector<1x128xf32> to vector<16x128xf32>
    %19 = arith.addf %16, %18 : vector<16x128xf32>
    %20 = math.tanh %19 : vector<16x128xf32>
    %cst_17 = arith.constant 2.000000e+00 : f32
    %21 = vector.broadcast %cst_17 : f32 to vector<16x128xf32>
    %22 = arith.mulf %20, %21 : vector<16x128xf32>
    %c0_18 = arith.constant 0 : index
    %c0_19 = arith.constant 0 : index
    %23 = vector.load %arg8[%c0_18, %c0_19] : memref<16x128xf32, #tpu.memory_space<vmem>>, vector<16x128xf32>
    tpu.vector_store %arg8[%c0_18, %c0_19], %22 {strides = array<i32>} : memref<16x128xf32, #tpu.memory_space<vmem>>, vector<16x128xf32>,
    return
  }
  func.func @transform_0(%arg0: i32) -> (i32, i32) {
    %c0_i32 = arith.constant 0 : i32
    %c0_i32_0 = arith.constant 0 : i32
    return %arg0, %c0_i32 : i32, i32
  }
  func.func @transform_1(%arg0: i32) -> (i32, i32) {
    %c0_i32 = arith.constant 0 : i32
    %c0_i32_0 = arith.constant 0 : i32
    %c0_i32_1 = arith.constant 0 : i32
    return %c0_i32, %c0_i32_0 : i32, i32
  }
  func.func @transform_2(%arg0: i32) -> (i32, i32) {
    %c0_i32 = arith.constant 0 : i32
    %c0_i32_0 = arith.constant 0 : i32
    %c0_i32_1 = arith.constant 0 : i32
    return %c0_i32, %c0_i32_0 : i32, i32
  }
  func.func @transform_3(%arg0: i32) -> (i32, i32) {
    %c0_i32 = arith.constant 0 : i32
    %c0_i32_0 = arith.constant 0 : i32
    %c0_i32_1 = arith.constant 0 : i32
    return %c0_i32, %c0_i32_0 : i32, i32
  }
  func.func @transform_4(%arg0: i32) -> (i32, i32) {
    %c0_i32 = arith.constant 0 : i32
    %c0_i32_0 = arith.constant 0 : i32
    %c0_i32_1 = arith.constant 0 : i32
    return %c0_i32, %c0_i32_0 : i32, i32
  }
  func.func @transform_5(%arg0: i32) -> (i32, i32) {
    %c0_i32 = arith.constant 0 : i32
    %c0_i32_0 = arith.constant 0 : i32
    %c0_i32_1 = arith.constant 0 : i32
    return %c0_i32, %c0_i32_0 : i32, i32
  }
  func.func @transform_6(%arg0: i32) -> (i32, i32) {
    %c0_i32 = arith.constant 0 : i32
    %c0_i32_0 = arith.constant 0 : i32
    %c0_i32_1 = arith.constant 0 : i32
    return %c0_i32, %c0_i32_0 : i32, i32
  }
  func.func @transform_7(%arg0: i32) -> (i32, i32) {
    %c0_i32 = arith.constant 0 : i32
    %c0_i32_0 = arith.constant 0 : i32
    return %arg0, %c0_i32 : i32, i32
  }
}

</mosaic_0001>

<bundles_post_ra>
// kernel: actor_forward.1
= control target key start
LH: loop header
LB: loop body
LE: loop exit
PB: predicated region body
PF: predicated region fallthrough
CT: control target
= control target key end

     0   :  { %s803_s1 = inlined_call_operand.vmem [shape: f32[128,128], index: 1, kind: input, shape index: {}]   ;;  %s804_s0 = inlined_call_operand.vmem [shape: f32[16,128], index: 0, kind: input, shape index: {}]   ;;  %s805_s3 = inlined_call_operand.vmem [shape: f32[128,128], index: 3, kind: input, shape index: {}]   ;;  %s806_s5 = inlined_call_operand.vmem [shape: f32[128,128], index: 5, kind: input, shape index: {}]   ;;  %s807_s2 = inlined_call_operand.vmem [shape: f32[1,128], index: 2, kind: input, shape index: {}]   ;;  %s808_s4 = inlined_call_operand.vmem [shape: f32[1,128], index: 4, kind: input, shape index: {}]   ;;  %s809_s6 = inlined_call_operand.vmem [shape: f32[1,128], index: 6, kind: input, shape index: {}]   ;;  %s810_s7 = inlined_call_operand.vmem [shape: f32[16,128], index: 7, kind: output, shape index: {}]  }
   0x1   :  { %v28_v0 = vld [vmem:[%s803_s1] sm:$0xff]  ;;  %v29_v1 = vld [vmem:[%s803_s1 + $0x8] sm:$0xff]  ;;  %v30_v2 = vld [vmem:[%s803_s1 + $0x10] sm:$0xff] }
   0x2   :  { %v498_v3 = vpack.c.bf16 %v29_v1, %v28_v0  ;;  %v31_v4 = vld [vmem:[%s803_s1 + $0x18] sm:$0xff]  ;;  %v32_v6 = vld [vmem:[%s803_s1 + $0x20] sm:$0xff]  ;;  %v33_v7 = vld [vmem:[%s803_s1 + $0x28] sm:$0xff] }
   0x3   :  { %v502_v5 = vpack.c.bf16 %v31_v4, %v30_v2  ;;  %v506_v8 = vpack.c.bf16 %v33_v7, %v32_v6  ;;  %v34_v9 = vld [vmem:[%s803_s1 + $0x30] sm:$0xff]  ;;  %v35_v10 = vld [vmem:[%s803_s1 + $0x38] sm:$0xff]  ;;  %v26_v11 = vld [vmem:[%s804_s0] sm:$0xff] }
   0x4   :  { %499 = vmatprep.subr.bf16.mxu0 %v498_v3  ;;  %425 = vmatprep.mubr.f32.mxu0 %v26_v11  ;;  %v128_v12 = vld [vmem:[%s805_s3] sm:$0xff]  ;;  %v129_v13 = vld [vmem:[%s805_s3 + $0x8] sm:$0xff]  ;;  %v130_v14 = vld [vmem:[%s805_s3 + $0x10] sm:$0xff]  ;;  %v510_v20 = vpack.c.bf16 %v35_v10, %v34_v9 }
   0x5   :  { %501 = vmatpush3.bf16.msra.mxu0 %v498_v3  ;;  %v530_v15 = vpack.c.bf16 %v129_v13, %v128_v12  ;;  %v131_v16 = vld [vmem:[%s805_s3 + $0x18] sm:$0xff]  ;;  %v132_v18 = vld [vmem:[%s805_s3 + $0x20] sm:$0xff]  ;;  %v133_v19 = vld [vmem:[%s805_s3 + $0x28] sm:$0xff] }
   0x6   :  { %503 = vmatprep.subr.bf16.mxu0 %v502_v5  ;;  %v534_v17 = vpack.c.bf16 %v131_v16, %v130_v14  ;;  %v36_v21 = vld [vmem:[%s803_s1 + $0x40] sm:$0xff]  ;;  %v37_v22 = vld [vmem:[%s803_s1 + $0x48] sm:$0xff]  ;;  %v538_v23 = vpack.c.bf16 %v133_v19, %v132_v18  ;;  %v134_v24 = vld [vmem:[%s805_s3 + $0x30] sm:$0xff] }
   0x7   :  { %531 = vmatprep.subr.bf16.mxu1 %v530_v15  ;;  %v135_v25 = vld [vmem:[%s805_s3 + $0x38] sm:$0xff]  ;;  %v514_v26 = vpack.c.bf16 %v37_v22, %v36_v21  ;;  %v38_v27 = vld [vmem:[%s803_s1 + $0x50] sm:$0xff]  ;;  %v136_v30 = vld [vmem:[%s805_s3 + $0x40] sm:$0xff] }
   0x8   :  { %533 = vmatpush3.bf16.msra.mxu1 %v530_v15  ;;  %v39_v28 = vld [vmem:[%s803_s1 + $0x58] sm:$0xff]  ;;  %v542_v29 = vpack.c.bf16 %v135_v25, %v134_v24  ;;  %v137_v31 = vld [vmem:[%s805_s3 + $0x48] sm:$0xff]  ;;  %v40_v33 = vld [vmem:[%s803_s1 + $0x60] sm:$0xff] }
   0x9   :  { %505 = vmatpush3.bf16.msra.mxu0 %v502_v5  ;;  %535 = vmatprep.subr.bf16.mxu1 %v534_v17  ;;  %v518_v32 = vpack.c.bf16 %v39_v28, %v38_v27  ;;  %v41_v34 = vld [vmem:[%s803_s1 + $0x68] sm:$0xff]  ;;  %v546_v35 = vpack.c.bf16 %v137_v31, %v136_v30  ;;  %v138_v36 = vld [vmem:[%s805_s3 + $0x50] sm:$0xff]  ;;  %v139_v37 = vld [vmem:[%s805_s3 + $0x58] sm:$0xff] }
   0xa   :  { %507 = vmatprep.subr.bf16.mxu0 %v506_v8  ;;  %v522_v38 = vpack.c.bf16 %v41_v34, %v40_v33  ;;  %v42_v39 = vld [vmem:[%s803_s1 + $0x70] sm:$0xff]  ;;  %v43_v40 = vld [vmem:[%s803_s1 + $0x78] sm:$0xff]  ;;  %v550_v41 = vpack.c.bf16 %v139_v37, %v138_v36  ;;  %v140_v42 = vld [vmem:[%s805_s3 + $0x60] sm:$0xff] }
   0xb   :  { %v141_v43 = vld [vmem:[%s805_s3 + $0x68] sm:$0xff]  ;;  %v526_v44 = vpack.c.bf16 %v43_v40, %v42_v39  ;;  %v142_v47 = vld [vmem:[%s805_s3 + $0x70] sm:$0xff]  ;;  %v143_v48 = vld [vmem:[%s805_s3 + $0x78] sm:$0xff] }
   0xc   :  { %537 = vmatpush3.bf16.msra.mxu1 %v534_v17  ;;  %v554_v45 = vpack.c.bf16 %v141_v43, %v140_v42  ;;  %v27_v46 = vld [vmem:[%s804_s0 + $0x8] sm:$0xff]  ;;  %v558_v49 = vpack.c.bf16 %v143_v48, %v142_v47  ;;  %v228_v50 = vld [vmem:[%s806_s5] sm:$0xff]  ;;  %v230_v52 = vld [vmem:[%s806_s5 + $0x10] sm:$0xff] }
   0xd   :  { %509 = vmatpush3.bf16.msra.mxu0 %v506_v8  ;;  %539 = vmatprep.subr.bf16.mxu1 %v538_v23  ;;  %v229_v51 = vld [vmem:[%s806_s5 + $0x8] sm:$0xff]  ;;  %v231_v54 = vld [vmem:[%s806_s5 + $0x18] sm:$0xff]  ;;  %v232_v56 = vld [vmem:[%s806_s5 + $0x20] sm:$0xff] }
   0xe   :  { %511 = vmatprep.subr.bf16.mxu0 %v510_v20  ;;  %v562_v53 = vpack.c.bf16 %v229_v51, %v228_v50  ;;  %v566_v55 = vpack.c.bf16 %v231_v54, %v230_v52  ;;  %v233_v57 = vld [vmem:[%s806_s5 + $0x28] sm:$0xff]  ;;  %v234_v59 = vld [vmem:[%s806_s5 + $0x30] sm:$0xff]  ;;  %v235_v60 = vld [vmem:[%s806_s5 + $0x38] sm:$0xff] }
   0xf   :  { %v570_v58 = vpack.c.bf16 %v233_v57, %v232_v56  ;;  %v574_v61 = vpack.c.bf16 %v235_v60, %v234_v59  ;;  %v236_v62 = vld [vmem:[%s806_s5 + $0x40] sm:$0xff]  ;;  %v237_v63 = vld [vmem:[%s806_s5 + $0x48] sm:$0xff]  ;;  %v238_v1 = vld [vmem:[%s806_s5 + $0x50] sm:$0xff] }
  0x10   :  { %541 = vmatpush3.bf16.msra.mxu1 %v538_v23  ;;  %v578_v0 = vpack.c.bf16 %v237_v63, %v236_v62  ;;  %v239_v2 = vld [vmem:[%s806_s5 + $0x58] sm:$0xff]  ;;  %v240_v4 = vld [vmem:[%s806_s5 + $0x60] sm:$0xff]  ;;  %v241_v5 = vld [vmem:[%s806_s5 + $0x68] sm:$0xff] }
  0x11   :  { %513 = vmatpush3.bf16.msra.mxu0 %v510_v20  ;;  %543 = vmatprep.subr.bf16.mxu1 %v542_v29  ;;  %v582_v3 = vpack.c.bf16 %v239_v2, %v238_v1  ;;  %v586_v6 = vpack.c.bf16 %v241_v5, %v240_v4  ;;  %v336_v7 = vld [vmem:[%s807_s2] ss:$0 sm:$0xff]  ;;  %v242_v14 = vld [vmem:[%s806_s5 + $0x70] sm:$0xff]  ;;  %v243_v15 = vld [vmem:[%s806_s5 + $0x78] sm:$0xff] }
  0x12   :  { %515 = vmatprep.subr.bf16.mxu0 %v514_v26  ;;  %v590_v16 = vpack.c.bf16 %v243_v15, %v242_v14  ;;  %v337_v17 = vld [vmem:[%s808_s4] ss:$0 sm:$0xff] }
  0x13   :  { %v338_v24 = vld [vmem:[%s809_s6] ss:$0 sm:$0xff] }
  0x14   :  { %545 = vmatpush3.bf16.msra.mxu1 %v542_v29 }
  0x15   :  { %517 = vmatpush3.bf16.msra.mxu0 %v514_v26  ;;  %547 = vmatprep.subr.bf16.mxu1 %v546_v35 }
  0x16   :  { %519 = vmatprep.subr.bf16.mxu0 %v518_v32 }
  0x18   :  { %549 = vmatpush3.bf16.msra.mxu1 %v546_v35 }
  0x19   :  { %521 = vmatpush3.bf16.msra.mxu0 %v518_v32  ;;  %551 = vmatprep.subr.bf16.mxu1 %v550_v41 }
  0x1a   :  { %523 = vmatprep.subr.bf16.mxu0 %v522_v38 }
  0x1c   :  { %553 = vmatpush3.bf16.msra.mxu1 %v550_v41 }
  0x1d   :  { %525 = vmatpush3.bf16.msra.mxu0 %v522_v38  ;;  %555 = vmatprep.subr.bf16.mxu1 %v554_v45 }
  0x1e   :  { %527 = vmatprep.subr.bf16.mxu0 %v526_v44 }
  0x20   :  { %557 = vmatpush3.bf16.msra.mxu1 %v554_v45 }
  0x21   :  { %529 = vmatpush3.bf16.msra.mxu0 %v526_v44  ;;  %559 = vmatprep.subr.bf16.mxu1 %v558_v49 }
  0x22   :  { %563 = vmatprep.subr.bf16.mxu0 %v562_v53 }
  0x24   :  { %426 = vmatmul.mubr.f32.vlgmr.msra.gmra.mrb[0].mxu0 %v27_v46  ;;  %561 = vmatpush3.bf16.msra.mxu1 %v558_v49 }
  0x25   :  { %565 = vmatpush3.bf16.msra.mxu0 %v562_v53 }
  0x26   :  { %567 = vmatprep.subr.bf16.mxu0 %v566_v55 }
  0x29   :  { %569 = vmatpush3.bf16.msra.mxu0 %v566_v55 }
  0x2a   :  { %571 = vmatprep.subr.bf16.mxu0 %v570_v58 }
  0x2d   :  { %573 = vmatpush3.bf16.msra.mxu0 %v570_v58 }
  0x2e   :  { %575 = vmatprep.subr.bf16.mxu0 %v574_v61 }
  0x31   :  { %577 = vmatpush3.bf16.msra.mxu0 %v574_v61 }
  0x32   :  { %579 = vmatprep.subr.bf16.mxu0 %v578_v0 }
  0x35   :  { %581 = vmatpush3.bf16.msra.mxu0 %v578_v0 }
  0x36   :  { %583 = vmatprep.subr.bf16.mxu0 %v582_v3 }
  0x39   :  { %585 = vmatpush3.bf16.msra.mxu0 %v582_v3 }
  0x3a   :  { %587 = vmatprep.subr.bf16.mxu0 %v586_v6 }
  0x3d   :  { %589 = vmatpush3.bf16.msra.mxu0 %v586_v6 }
  0x3e   :  { %591 = vmatprep.subr.bf16.mxu0 %v590_v16 }
  0x41   :  { %593 = vmatpush3.bf16.msra.mxu0 %v590_v16 }
  0xf7   :  { %v427_v8 = vpop.f32.mrb[0].mxu0 }
  0xf8   :  { %v123_v9 = vadd.f32 %v427_v8, %v336_v7  ;;  %v117_v10 = vpop.f32.mrb[1].mxu0 }
  0xf9   :  { %v118_v11 = vadd.f32 %v336_v7, %v117_v10 }
  0xfa   :  { %v127_v13 = vmax.f32 %v123_v9, 0.0 }
  0xfb   :  { %v126_v12 = vmax.f32 %v118_v11, 0.0 }
  0xfd   :  { %460 = vmatprep.mubr.f32.mxu1 %v126_v12 }
  0xfe   :  { %461 = vmatmul.mubr.f32.vlgmr.msra.gmra.mrb[0].mxu1 %v127_v13 }
 0x1d1   :  { %v462_v18 = vpop.f32.mrb[0].mxu1 }
 0x1d2   :  { %v223_v19 = vadd.f32 %v462_v18, %v337_v17  ;;  %v217_v20 = vpop.f32.mrb[1].mxu1 }
 0x1d3   :  { %v218_v21 = vadd.f32 %v337_v17, %v217_v20 }
 0x1d4   :  { %v227_v23 = vmax.f32 %v223_v19, 0.0 }
 0x1d5   :  { %v226_v22 = vmax.f32 %v218_v21, 0.0 }
 0x1d7   :  { %495 = vmatprep.mubr.f32.mxu0 %v226_v22 }
 0x1d8   :  { %496 = vmatmul.mubr.f32.vlgmr.msra.gmra.mrb[2].mxu0 %v227_v23 }
 0x2ab   :  { %v497_v25 = vpop.f32.mrb[2].mxu0 }
 0x2ac   :  { %v323_v26 = vadd.f32 %v497_v25, %v338_v24  ;;  %v317_v27 = vpop.f32.mrb[3].mxu0 }
 0x2ad   :  { %v318_v28 = vadd.f32 %v338_v24, %v317_v27 }
 0x2ae   :  { %594 = vtanh.f32 %v323_v26 }
 0x2af   :  { %596 = vtanh.f32 %v318_v28 }
 0x2b8   :  { %v595_v29 = vpop.eup %594 }
 0x2b9   :  { %v597_v30 = vpop.eup %596  ;;  %v329_v31 = vmul.f32 2.0, %v595_v29 }
 0x2ba   :  { %v328_v32 = vmul.f32 2.0, %v597_v30 }
 0x2bb   :  { %331 = vst [vmem:[%s810_s7 + $0x8] sm:$0xff] %v329_v31 }
 0x2bc   :  { %330 = vst [vmem:[%s810_s7] sm:$0xff] %v328_v32 }

</bundles_post_ra>
